<compile_context>
chip_gen: v6e
topology: v6e:2x2x1
jax: 0.10.0
libtpu: 0.0.40
codegen_flags: <defaults>
</compile_context>

<pallas_src>
import jax
import jax.numpy as jnp
from jax.experimental import pallas as pl
from jax.experimental.pallas import tpu as pltpu

_BN_EPS = 1e-5
_LANES = 128


def _round_up(x, m):
    return (x + m - 1) // m * m


def _make_kernel(N, C, D, row_fc2, row_head, row_bfc2, row_bhead):
    CD = C * D
    ROW_W1A = 0          # rows [0, D)   : fc1 weight rows for the conv1/BN branch
    ROW_W1B = D          # row  D        : fc1 weight row for the conv2 scalar
    ROW_B1 = D + 1       # row  D+1      : fc1 bias
    inv_nd = 1.0 / float(N * D)

    def kernel(scal_ref, data_ref, w1e_ref, k0_ref, w2_ref, fc_ref, out_ref):
        gamma = scal_ref[0]
        beta = scal_ref[1]
        b2 = scal_ref[2]

        # ---- conv1: per-(n,c,d) partial dot over the H*W lanes ----
        psum = jnp.sum(data_ref[...] * w1e_ref[...], axis=-1, keepdims=True)  # (N*C*D, 1)

        # Sum the C channel groups with static sublane slices -> per-batch (D, 1).
        h1 = []
        for n in range(N):
            acc = psum[n * CD:n * CD + D, :]
            for c in range(1, C):
                acc = acc + psum[n * CD + c * D:n * CD + (c + 1) * D, :]
            h1.append(acc)

        # ---- BatchNorm3d(1), training mode: biased batch stats over all (n, d) ----
        s_tot = jnp.sum(h1[0])
        for n in range(1, N):
            s_tot = s_tot + jnp.sum(h1[n])
        mean = s_tot * inv_nd
        v_tot = jnp.sum((h1[0] - mean) ** 2)
        for n in range(1, N):
            v_tot = v_tot + jnp.sum((h1[n] - mean) ** 2)
        var = v_tot * inv_nd
        scale = gamma * jax.lax.rsqrt(var + _BN_EPS)
        # Reference returns head(h)[0]: only batch row 0 feeds fc1/fc2/heads.
        h1_0 = (h1[0] - mean) * scale + beta                      # (D, 1)

        # ---- conv2: kernel size == k0 spatial size -> single scalar ----
        c2 = jnp.sum(k0_ref[...] * w2_ref[...]) + b2

        # ---- fc1 on concat([h1 row-0 features, c2]) via sublane-bcast + reduce ----
        z = jnp.sum(h1_0 * fc_ref[ROW_W1A:ROW_W1A + D, :], axis=0, keepdims=True)
        z = z + c2 * fc_ref[ROW_W1B:ROW_W1B + 1, :] + fc_ref[ROW_B1:ROW_B1 + 1, :]
        z = jnp.maximum(z, 0.0)        # (1, 128); lanes >= 10 are exactly zero

        # ---- fc2: (128,128) zero-padded weight -> one MXU pass, no lane slicing ----
        z = jnp.dot(z, fc_ref[row_fc2:row_fc2 + _LANES, :],
                    preferred_element_type=jnp.float32)
        z = jnp.maximum(z + fc_ref[row_bfc2:row_bfc2 + 1, :], 0.0)

        # ---- fused heads [fc_s|fc_r|fc_x|fc_y]: one MXU pass, lane-dense store ----
        out = jnp.dot(z, fc_ref[row_head:row_head + _LANES, :],
                      preferred_element_type=jnp.float32)
        out_ref[...] = out + fc_ref[row_bhead:row_bhead + 1, :]

    return kernel


def make_mlp_basic_forward(params, *, N, C, D, H, W, ksize, t_out, k_in_ch):
    """One-time setup: packs every parameter tensor into kernel-ready slabs and
    returns a jitted forward(data, k0) whose per-call work is just two contiguous
    reshapes + a single pallas_call."""
    HW = H * W
    K2 = k_in_ch * ksize[0] * ksize[1]
    assert params["fc1_w"].shape == (D + 1, 10)
    assert max(10, 4 * t_out) <= _LANES and K2 <= _LANES

    # conv1 weight expanded so row (n*C*D + c*D + d) matches data.reshape(N*C*D, HW).
    w1c = jnp.asarray(params["conv1_w"], jnp.float32).reshape(C, HW)
    w1e = jnp.tile(jnp.repeat(w1c, D, axis=0), (N, 1))            # (N*C*D, HW)

    # conv2 weight flattened to match k0.reshape(1, K2).
    w2r = jnp.asarray(params["conv2_w"], jnp.float32).reshape(1, K2)

    # fc slab layout (rows zero-padded to 128 lanes; big blocks 8-row aligned).
    ROW_FC2 = _round_up(D + 2, 8)
    ROW_HEAD = ROW_FC2 + _LANES
    ROW_BFC2 = ROW_HEAD + _LANES
    ROW_BHEAD = ROW_BFC2 + 1
    TOTAL = _round_up(ROW_BHEAD + 1, 8)

    # NOTE: fc weights are stored (in, out) == torch .weight.T.
    whead = jnp.concatenate([params["fc_s_w"], params["fc_r_w"],
                             params["fc_x_w"], params["fc_y_w"]], axis=1)  # (10, 4*t_out)
    bhead = jnp.concatenate([params["fc_s_b"], params["fc_r_b"],
                             params["fc_x_b"], params["fc_y_b"]])          # (4*t_out,)

    slab = jnp.zeros((TOTAL, _LANES), jnp.float32)
    slab = slab.at[0:D, 0:10].set(params["fc1_w"][:D, :])
    slab = slab.at[D, 0:10].set(params["fc1_w"][D, :])
    slab = slab.at[D + 1, 0:10].set(params["fc1_b"])
    slab = slab.at[ROW_FC2:ROW_FC2 + 10, 0:10].set(params["fc2_w"])
    slab = slab.at[ROW_BFC2, 0:10].set(params["fc2_b"])
    slab = slab.at[ROW_HEAD:ROW_HEAD + 10, 0:4 * t_out].set(whead)
    slab = slab.at[ROW_BHEAD, 0:4 * t_out].set(bhead)

    # BN affine + conv2 bias scalars -> SMEM (no per-scalar VMEM tile DMA).
    scal = jnp.stack([params["bn1_w"][0], params["bn1_b"][0],
                      params["conv2_b"][0]]).astype(jnp.float32)           # (3,)

    kernel = _make_kernel(N, C, D, ROW_FC2, ROW_HEAD, ROW_BFC2, ROW_BHEAD)

    call = pl.pallas_call(
        kernel,
        out_shape=jax.ShapeDtypeStruct((1, _LANES), jnp.float32),
        in_specs=[
            pl.BlockSpec(memory_space=pltpu.MemorySpace.SMEM),   # scal
            pl.BlockSpec(memory_space=pltpu.MemorySpace.VMEM),   # data (N*C*D, HW)
            pl.BlockSpec(memory_space=pltpu.MemorySpace.VMEM),   # expanded conv1 w
            pl.BlockSpec(memory_space=pltpu.MemorySpace.VMEM),   # k0 (1, K2)
            pl.BlockSpec(memory_space=pltpu.MemorySpace.VMEM),   # conv2 w (1, K2)
            pl.BlockSpec(memory_space=pltpu.MemorySpace.VMEM),   # fc slab
        ],
        out_specs=pl.BlockSpec(memory_space=pltpu.MemorySpace.VMEM),
    )

    @jax.jit
    def forward(data, k0):
        data2 = data.reshape(N * C * D, HW)   # contiguous collapse, no transpose
        k0r = k0.reshape(1, K2)               # contiguous collapse
        out = call(scal, data2, w1e, k0r, w2r, slab)
        heads = out[0, :4 * t_out]
        s, r, x, y = jnp.split(heads, 4)
        return s, r, x, y

    return forward


def init_params(key, ksize, t_out, k_in_ch):
    # Deterministic synthetic init (shapes match the PyTorch module; fc weights
    # are stored transposed, i.e. (in, out) == torch .weight.T).
    keys = jax.random.split(key, 15)

    def u(k, shape, scale=0.1):
        return jax.random.uniform(k, shape, jnp.float32, -scale, scale)

    kh, kw = ksize
    return dict(
        conv1_w=u(keys[0], (1, 3, 1, 7, 9)),             # Conv3d, bias=False
        bn1_w=jnp.ones((1,), jnp.float32),               # BatchNorm3d(1)
        bn1_b=jnp.zeros((1,), jnp.float32),
        conv2_w=u(keys[1], (1, k_in_ch, kh, kw)),        # Conv2d
        conv2_b=u(keys[2], (1,)),
        fc1_w=u(keys[3], (31, 10)),
        fc1_b=u(keys[4], (10,)),
        fc2_w=u(keys[5], (10, 10)),
        fc2_b=u(keys[6], (10,)),
        fc_s_w=u(keys[7], (10, t_out)), fc_s_b=u(keys[8], (t_out,)),
        fc_r_w=u(keys[9], (10, t_out)), fc_r_b=u(keys[10], (t_out,)),
        fc_x_w=u(keys[11], (10, t_out)), fc_x_b=u(keys[12], (t_out,)),
        fc_y_w=u(keys[13], (10, t_out)), fc_y_b=u(keys[14], (t_out,)),
    )
    # TODO(synk): BatchNorm running-stat updates (training-mode side effect) are not
    # modeled; they do not affect the returned forward values.


if __name__ == "__main__":
    key = jax.random.PRNGKey(0)
    k_data, k_k0, k_params = jax.random.split(key, 3)

    # Shapes implied by fc1.in_features == 31: conv1 collapses (7,9) -> 1x1,
    # conv2 collapses k0's spatial dims -> 1x1, so D + 1 == 31 -> D = 30.
    N, C, D, H, W = 2, 3, 30, 7, 9
    ksize, t_out, k_in_ch = (3, 3), 6, 4

    data = jax.random.normal(k_data, (N, C, D, H, W), jnp.float32)
    k0 = jax.random.normal(k_k0, (k_in_ch, ksize[0], ksize[1]), jnp.float32)
    params = init_params(k_params, ksize, t_out, k_in_ch)

    forward = make_mlp_basic_forward(params, N=N, C=C, D=D, H=H, W=W,
                                     ksize=ksize, t_out=t_out, k_in_ch=k_in_ch)
    s, r, x, y = forward(data, k0)
    jax.block_until_ready((s, r, x, y))
    assert s.shape == (t_out,) and r.shape == (t_out,)
    assert x.shape == (t_out,) and y.shape == (t_out,)
    print("KERNEL_OK")
</pallas_src>

<mosaic_0001>
module attributes {stable_mosaic.version = 11 : i64} {
  func.func @kernel(%arg0: memref<3xf32, #tpu.memory_space<smem>>, %arg1: memref<180x63xf32, #tpu.memory_space<vmem>>, %arg2: memref<180x63xf32, #tpu.memory_space<vmem>>, %arg3: memref<1x36xf32, #tpu.memory_space<vmem>>, %arg4: memref<1x36xf32, #tpu.memory_space<vmem>>, %arg5: memref<296x128xf32, #tpu.memory_space<vmem>>, %arg6: memref<1x128xf32, #tpu.memory_space<vmem>>) attributes {dimension_semantics = [], scalar_prefetch = 0 : i64, scratch_operands = 0 : i64, tpu.core_type = #tpu.core_type<tc>} {
    %c0 = arith.constant 0 : index
    %0 = memref.load %arg0[%c0] : memref<3xf32, #tpu.memory_space<smem>>
    %c1 = arith.constant 1 : index
    %1 = memref.load %arg0[%c1] : memref<3xf32, #tpu.memory_space<smem>>
    %c2 = arith.constant 2 : index
    %2 = memref.load %arg0[%c2] : memref<3xf32, #tpu.memory_space<smem>>
    %c0_0 = arith.constant 0 : index
    %c0_1 = arith.constant 0 : index
    %3 = vector.load %arg1[%c0_0, %c0_1] : memref<180x63xf32, #tpu.memory_space<vmem>>, vector<180x63xf32>
    %c0_2 = arith.constant 0 : index
    %c0_3 = arith.constant 0 : index
    %4 = vector.load %arg2[%c0_2, %c0_3] : memref<180x63xf32, #tpu.memory_space<vmem>>, vector<180x63xf32>
    %5 = arith.mulf %3, %4 : vector<180x63xf32>
    %cst = arith.constant dense<0.000000e+00> : vector<180xf32>
    %6 = vector.multi_reduction <add>, %5, %cst [1] : vector<180x63xf32> to vector<180xf32>
    %7 = vector.shape_cast %6 : vector<180xf32> to vector<180x1xf32>
    %8 = vector.extract_strided_slice %7 {offsets = [0, 0], sizes = [30, 1], strides = [1, 1]} : vector<180x1xf32> to vector<30x1xf32>
    %9 = vector.extract_strided_slice %7 {offsets = [30, 0], sizes = [30, 1], strides = [1, 1]} : vector<180x1xf32> to vector<30x1xf32>
    %10 = arith.addf %8, %9 : vector<30x1xf32>
    %11 = vector.extract_strided_slice %7 {offsets = [60, 0], sizes = [30, 1], strides = [1, 1]} : vector<180x1xf32> to vector<30x1xf32>
    %12 = arith.addf %10, %11 : vector<30x1xf32>
    %13 = vector.extract_strided_slice %7 {offsets = [90, 0], sizes = [30, 1], strides = [1, 1]} : vector<180x1xf32> to vector<30x1xf32>
    %14 = vector.extract_strided_slice %7 {offsets = [120, 0], sizes = [30, 1], strides = [1, 1]} : vector<180x1xf32> to vector<30x1xf32>
    %15 = arith.addf %13, %14 : vector<30x1xf32>
    %16 = vector.extract_strided_slice %7 {offsets = [150, 0], sizes = [30, 1], strides = [1, 1]} : vector<180x1xf32> to vector<30x1xf32>
    %17 = arith.addf %15, %16 : vector<30x1xf32>
    %18 = vector.shape_cast %12 : vector<30x1xf32> to vector<1x30x1xf32>
    %cst_4 = arith.constant dense<0.000000e+00> : vector<1xf32>
    %19 = vector.multi_reduction <add>, %18, %cst_4 [1, 2] : vector<1x30x1xf32> to vector<1xf32>
    %20 = vector.shape_cast %19 : vector<1xf32> to vector<1x1x1xf32>
    %21 = vector.extract %20[0, 0, 0] : f32 from vector<1x1x1xf32>
    %22 = vector.shape_cast %17 : vector<30x1xf32> to vector<1x30x1xf32>
    %cst_5 = arith.constant dense<0.000000e+00> : vector<1xf32>
    %23 = vector.multi_reduction <add>, %22, %cst_5 [1, 2] : vector<1x30x1xf32> to vector<1xf32>
    %24 = vector.shape_cast %23 : vector<1xf32> to vector<1x1x1xf32>
    %25 = vector.extract %24[0, 0, 0] : f32 from vector<1x1x1xf32>
    %26 = arith.addf %21, %25 : f32
    %cst_6 = arith.constant 0.0166666675 : f32
    %27 = arith.mulf %26, %cst_6 : f32
    %28 = vector.broadcast %27 : f32 to vector<30x1xf32>
    %29 = arith.subf %12, %28 : vector<30x1xf32>
    %30 = arith.mulf %29, %29 : vector<30x1xf32>
    %31 = vector.shape_cast %30 : vector<30x1xf32> to vector<1x30x1xf32>
    %cst_7 = arith.constant dense<0.000000e+00> : vector<1xf32>
    %32 = vector.multi_reduction <add>, %31, %cst_7 [1, 2] : vector<1x30x1xf32> to vector<1xf32>
    %33 = vector.shape_cast %32 : vector<1xf32> to vector<1x1x1xf32>
    %34 = vector.extract %33[0, 0, 0] : f32 from vector<1x1x1xf32>
    %35 = vector.broadcast %27 : f32 to vector<30x1xf32>
    %36 = arith.subf %17, %35 : vector<30x1xf32>
    %37 = arith.mulf %36, %36 : vector<30x1xf32>
    %38 = vector.shape_cast %37 : vector<30x1xf32> to vector<1x30x1xf32>
    %cst_8 = arith.constant dense<0.000000e+00> : vector<1xf32>
    %39 = vector.multi_reduction <add>, %38, %cst_8 [1, 2] : vector<1x30x1xf32> to vector<1xf32>
    %40 = vector.shape_cast %39 : vector<1xf32> to vector<1x1x1xf32>
    %41 = vector.extract %40[0, 0, 0] : f32 from vector<1x1x1xf32>
    %42 = arith.addf %34, %41 : f32
    %cst_9 = arith.constant 0.0166666675 : f32
    %43 = arith.mulf %42, %cst_9 : f32
    %cst_10 = arith.constant 9.99999974E-6 : f32
    %44 = arith.addf %43, %cst_10 : f32
    %45 = math.rsqrt %44 : f32
    %46 = arith.mulf %0, %45 : f32
    %47 = vector.broadcast %27 : f32 to vector<30x1xf32>
    %48 = arith.subf %12, %47 : vector<30x1xf32>
    %49 = vector.broadcast %46 : f32 to vector<30x1xf32>
    %50 = arith.mulf %48, %49 : vector<30x1xf32>
    %51 = vector.broadcast %1 : f32 to vector<30x1xf32>
    %52 = arith.addf %50, %51 : vector<30x1xf32>
    %c0_11 = arith.constant 0 : index
    %c0_12 = arith.constant 0 : index
    %53 = vector.load %arg3[%c0_11, %c0_12] : memref<1x36xf32, #tpu.memory_space<vmem>>, vector<1x36xf32>
    %c0_13 = arith.constant 0 : index
    %c0_14 = arith.constant 0 : index
    %54 = vector.load %arg4[%c0_13, %c0_14] : memref<1x36xf32, #tpu.memory_space<vmem>>, vector<1x36xf32>
    %55 = arith.mulf %53, %54 : vector<1x36xf32>
    %56 = vector.shape_cast %55 : vector<1x36xf32> to vector<1x1x36xf32>
    %cst_15 = arith.constant dense<0.000000e+00> : vector<1xf32>
    %57 = vector.multi_reduction <add>, %56, %cst_15 [1, 2] : vector<1x1x36xf32> to vector<1xf32>
    %58 = vector.shape_cast %57 : vector<1xf32> to vector<1x1x1xf32>
    %59 = vector.extract %58[0, 0, 0] : f32 from vector<1x1x1xf32>
    %60 = arith.addf %59, %2 : f32
    %c0_16 = arith.constant 0 : index
    %c0_17 = arith.constant 0 : index
    %61 = vector.load %arg5[%c0_16, %c0_17] : memref<296x128xf32, #tpu.memory_space<vmem>>, vector<30x128xf32>
    %62 = vector.broadcast %52 : vector<30x1xf32> to vector<30x128xf32>
    %63 = arith.mulf %62, %61 : vector<30x128xf32>
    %cst_18 = arith.constant dense<0.000000e+00> : vector<128xf32>
    %64 = vector.multi_reduction <add>, %63, %cst_18 [0] : vector<30x128xf32> to vector<128xf32>
    %65 = vector.shape_cast %64 : vector<128xf32> to vector<1x128xf32>
    %c30 = arith.constant 30 : index
    %c0_19 = arith.constant 0 : index
    %66 = vector.load %arg5[%c30, %c0_19] : memref<296x128xf32, #tpu.memory_space<vmem>>, vector<1x128xf32>
    %67 = vector.broadcast %60 : f32 to vector<1x128xf32>
    %68 = arith.mulf %67, %66 : vector<1x128xf32>
    %69 = arith.addf %65, %68 : vector<1x128xf32>
    %c31 = arith.constant 31 : index
    %c0_20 = arith.constant 0 : index
    %70 = vector.load %arg5[%c31, %c0_20] : memref<296x128xf32, #tpu.memory_space<vmem>>, vector<1x128xf32>
    %71 = arith.addf %69, %70 : vector<1x128xf32>
    %cst_21 = arith.constant 0.000000e+00 : f32
    %72 = vector.broadcast %cst_21 : f32 to vector<1x128xf32>
    %73 = arith.maximumf %71, %72 : vector<1x128xf32>
    %c32 = arith.constant 32 : index
    %c0_22 = arith.constant 0 : index
    %74 = vector.load %arg5[%c32, %c0_22] : memref<296x128xf32, #tpu.memory_space<vmem>>, vector<128x128xf32>
    %cst_23 = arith.constant dense<0.000000e+00> : vector<1x128xf32>
    %75 = tpu.matmul %73, %74, %cst_23 {dimension_numbers = #tpu.dot_dimension_numbers<[1], [0], [0], [1], [0, 0, 1, 1], [], []>} : vector<1x128xf32>, vector<128x128xf32>, vector<1x128xf32> -> vector<1x128xf32>
    %c288 = arith.constant 288 : index
    %c0_24 = arith.constant 0 : index
    %76 = vector.load %arg5[%c288, %c0_24] : memref<296x128xf32, #tpu.memory_space<vmem>>, vector<1x128xf32>
    %77 = arith.addf %75, %76 : vector<1x128xf32>
    %cst_25 = arith.constant 0.000000e+00 : f32
    %78 = vector.broadcast %cst_25 : f32 to vector<1x128xf32>
    %79 = arith.maximumf %77, %78 : vector<1x128xf32>
    %c160 = arith.constant 160 : index
    %c0_26 = arith.constant 0 : index
    %80 = vector.load %arg5[%c160, %c0_26] : memref<296x128xf32, #tpu.memory_space<vmem>>, vector<128x128xf32>
    %cst_27 = arith.constant dense<0.000000e+00> : vector<1x128xf32>
    %81 = tpu.matmul %79, %80, %cst_27 {dimension_numbers = #tpu.dot_dimension_numbers<[1], [0], [0], [1], [0, 0, 1, 1], [], []>} : vector<1x128xf32>, vector<128x128xf32>, vector<1x128xf32> -> vector<1x128xf32>
    %c289 = arith.constant 289 : index
    %c0_28 = arith.constant 0 : index
    %82 = vector.load %arg5[%c289, %c0_28] : memref<296x128xf32, #tpu.memory_space<vmem>>, vector<1x128xf32>
    %83 = arith.addf %81, %82 : vector<1x128xf32>
    %c0_29 = arith.constant 0 : index
    %c0_30 = arith.constant 0 : index
    %84 = vector.load %arg6[%c0_29, %c0_30] : memref<1x128xf32, #tpu.memory_space<vmem>>, vector<1x128xf32>
    tpu.vector_store %arg6[%c0_29, %c0_30], %83 {strides = array<i32>} : memref<1x128xf32, #tpu.memory_space<vmem>>, vector<1x128xf32>,
    return
  }
}

</mosaic_0001>

<bundles_post_ra>
// kernel: forward.1
= control target key start
LH: loop header
LB: loop body
LE: loop exit
PB: predicated region body
PF: predicated region fallthrough
CT: control target
= control target key end

     0   :  { %11 = vsyncpa [#allocation3], 0  ;;  %s1228_s0 = inlined_call_operand.vmem [shape: f32[3], index: 0, kind: input, shape index: {}]   ;;  %s1229_s1 = inlined_call_operand.vmem [shape: f32[180,63], index: 1, kind: input, shape index: {}]   ;;  %s1230_s2 = inlined_call_operand.vmem [shape: f32[180,63], index: 2, kind: input, shape index: {}]   ;;  %s1231_s3 = inlined_call_operand.vmem [shape: f32[1,36], index: 3, kind: input, shape index: {}]   ;;  %s1232_s4 = inlined_call_operand.vmem [shape: f32[1,36], index: 4, kind: input, shape index: {}]   ;;  %s1233_s5 = inlined_call_operand.vmem [shape: f32[296,128], index: 5, kind: input, shape index: {}]   ;;  %s1234_s6 = inlined_call_operand.vmem [shape: f32[1,128], index: 6, kind: output, shape index: {}]  }
   0x1   :  { %s18_s23 = sshll.u32 %s1228_s0, 4  ;;  %s19_s23 = int_to_ptr.vmem [resolvable:$true] %s18_s23 }
   0x2   :  { %s764_s24 = scalar_lea.vmem %s19_s23, 16  ;;  %p769_p1 = scmp.lt.s32.totalorder %s19_s23, %s19_s23 }
   0x3   :  { %p765_p0 = scmp.ne.s32.totalorder %s19_s23, %s764_s24  ;;  %p770_p2 = scmp.lt.s32.totalorder %s764_s24, %s764_s24 }
   0x5   :  { %p771_p3 = por %p770_p2, %p769_p1 }
   0x7   :  { %p772_p4 = pnand %p771_p3, %p765_p0 }
   0x9   :  { %775 = shalt.err (!%p772_p4)
}
   0xa   :  { %s778_s25 = smov [#allocation2]  }
   0xb   :  { %21 = dma.vmem_to_smem %s19_s23, 16, %s778_s25, [#allocation3]  }
   0xc   :  { %776 = dma.done.wait [#allocation3], 16  }
   0xd   :  { %777 = vsyncadd [#allocation3], 4294967280 }
   0xe   :  { %35 = sfence }
   0xf   :  { %v56_v0 = vld [vmem:[%s1229_s1 + $0x88] sm:$0xff]  ;;  %vm108_vm0 = vcmask 515072   ;;  %v54_v2 = vld [vmem:[%s1229_s1 + $0x78] sm:$0xff]  ;;  %v57_v5 = vld [vmem:[%s1229_s1 + $0x90] sm:$0xff]  ;;  %vm175_vm1 = vcmask 510976   ;;  %vm184_vm2 = vcmask 1041408  }
  0x10   :  { %v79_v1 = vld [vmem:[%s1230_s2 + $0x88] sm:$0xff]  ;;  %v77_v4 = vld [vmem:[%s1230_s2 + $0x78] sm:$0xff]  ;;  %v80_v6 = vld [vmem:[%s1230_s2 + $0x90] sm:$0xff]  ;;  %vm206_vm3 = vcmask 1043456   ;;  %vm286_vm4 = vcmask 1045504   ;;  %vm264_vm5 = vcmask 7168  }
  0x11   :  { %v102_v3 = vmul.f32 %v79_v1, %v56_v0  ;;  %v100_v7 = vmul.f32 %v77_v4, %v54_v2  ;;  %v103_v8 = vmul.f32 %v80_v6, %v57_v5  ;;  %v55_v9 = vld [vmem:[%s1229_s1 + $0x80] sm:$0xff]  ;;  %v58_v15 = vld [vmem:[%s1229_s1 + $0x98] sm:$0xff]  ;;  %v60_v24 = vld [vmem:[%s1229_s1 + $0xa8] sm:$0xff]  ;;  %vm270_vm6 = vcmask 5120   ;;  %s36_s27 = sld [smem:[#allocation2]] }
  0x12   :  { %v78_v10 = vld [vmem:[%s1230_s2 + $0x80] sm:$0xff]  ;;  %v81_v16 = vld [vmem:[%s1230_s2 + $0x98] sm:$0xff]  ;;  %v83_v25 = vld [vmem:[%s1230_s2 + $0xa8] sm:$0xff]  ;;  %vm400_vm7 = vcmask 286720   ;;  %s638_s28 = sld [smem:[#allocation2 + $0x1]]  ;;  %vm781_vm8 = vmmov 0  }
  0x13   :  { %v59_v11 = vld [vmem:[%s1229_s1 + $0xa0] sm:$0xff]  ;;  %v160_v12 = vsel %vm108_vm0, %v102_v3, 0.0  ;;  %v101_v13 = vmul.f32 %v78_v10, %v55_v9  ;;  %v154_v17 = vsel %vm108_vm0, %v100_v7, 0.0  ;;  %v163_v18 = vsel %vm108_vm0, %v103_v8, 0.0  ;;  %v42_v22 = vld [vmem:[%s1229_s1 + $0x18] sm:$0xff]  ;;  %v44_v30 = vld [vmem:[%s1229_s1 + $0x28] sm:$0xff] }
  0x14   :  { %v82_v14 = vld [vmem:[%s1230_s2 + $0xa0] sm:$0xff]  ;;  %161 = vadd.xlane.f32.xlu1 %v160_v12  ;;  %155 = vadd.xlane.f32.xlu0 %v154_v17  ;;  %v104_v21 = vmul.f32 %v81_v16, %v58_v15  ;;  %v65_v23 = vld [vmem:[%s1230_s2 + $0x18] sm:$0xff]  ;;  %v106_v29 = vmul.f32 %v83_v25, %v60_v24  ;;  %v67_v31 = vld [vmem:[%s1230_s2 + $0x28] sm:$0xff]  ;;  %s639_s14 = sld [smem:[#allocation2 + $0x2]] }
  0x15   :  { %v105_v19 = vmul.f32 %v82_v14, %v59_v11  ;;  %v157_v20 = vsel %vm108_vm0, %v101_v13, 0.0  ;;  %v88_v27 = vmul.f32 %v65_v23, %v42_v22  ;;  %v43_v32 = vld [vmem:[%s1229_s1 + $0x20] sm:$0xff]  ;;  %v90_v35 = vmul.f32 %v67_v31, %v44_v30  ;;  %v50_v40 = vld [vmem:[%s1229_s1 + $0x58] sm:$0xff]  ;;  %v61_v46 = vld [vmem:[%s1229_s1 + $0xb0] sm:$0xf] }
  0x16   :  { %v166_v28 = vsel %vm108_vm0, %v104_v21, 0.0  ;;  %v66_v33 = vld [vmem:[%s1230_s2 + $0x20] sm:$0xff]  ;;  %v172_v36 = vsel %vm108_vm0, %v106_v29, 0.0  ;;  %v73_v41 = vld [vmem:[%s1230_s2 + $0x58] sm:$0xff]  ;;  %v84_v47 = vld [vmem:[%s1230_s2 + $0xb0] sm:$0xf] }
  0x17   :  { %v169_v26 = vsel %vm108_vm0, %v105_v19, 0.0  ;;  %v118_v34 = vsel %vm108_vm0, %v88_v27, 0.0  ;;  %v89_v37 = vmul.f32 %v66_v33, %v43_v32  ;;  %v51_v38 = vld [vmem:[%s1229_s1 + $0x60] sm:$0xff]  ;;  %v124_v42 = vsel %vm108_vm0, %v90_v35, 0.0  ;;  %v52_v48 = vld [vmem:[%s1229_s1 + $0x68] sm:$0xff]  ;;  %v46_v54 = vld [vmem:[%s1229_s1 + $0x38] sm:$0xff] }
  0x18   :  { %164 = vadd.xlane.f32.xlu1 %v163_v18  ;;  %158 = vadd.xlane.f32.xlu0 %v157_v20  ;;  %v74_v39 = vld [vmem:[%s1230_s2 + $0x60] sm:$0xff]  ;;  %v96_v45 = vmul.f32 %v73_v41, %v50_v40  ;;  %v75_v49 = vld [vmem:[%s1230_s2 + $0x68] sm:$0xff]  ;;  %v107_v51 = vmul.f32 %v84_v47, %v61_v46  ;;  %v69_v55 = vld [vmem:[%s1230_s2 + $0x38] sm:$0xff] }
  0x19   :  { %v97_v43 = vmul.f32 %v74_v39, %v51_v38  ;;  %v121_v44 = vsel %vm108_vm0, %v89_v37, 0.0  ;;  %v98_v53 = vmul.f32 %v75_v49, %v52_v48  ;;  %v45_v56 = vld [vmem:[%s1229_s1 + $0x30] sm:$0xff]  ;;  %v92_v59 = vmul.f32 %v69_v55, %v46_v54  ;;  %v48_v62 = vld [vmem:[%s1229_s1 + $0x48] sm:$0xff]  ;;  %v47_v0 = vld [vmem:[%s1229_s1 + $0x40] sm:$0xff] }
  0x1a   :  { %v142_v52 = vsel %vm108_vm0, %v96_v45, 0.0  ;;  %v68_v57 = vld [vmem:[%s1230_s2 + $0x30] sm:$0xff]  ;;  %v176_v58 = vsel %vm175_vm1, %v107_v51, 0.0  ;;  %v71_v63 = vld [vmem:[%s1230_s2 + $0x48] sm:$0xff]  ;;  %v70_v1 = vld [vmem:[%s1230_s2 + $0x40] sm:$0xff] }
  0x1b   :  { %v145_v50 = vsel %vm108_vm0, %v97_v43, 0.0  ;;  %v148_v60 = vsel %vm108_vm0, %v98_v53, 0.0  ;;  %v91_v61 = vmul.f32 %v68_v57, %v45_v56  ;;  %v130_v2 = vsel %vm108_vm0, %v92_v59, 0.0  ;;  %v39_v6 = vld [vmem:[%s1229_s1] sm:$0xff]  ;;  %v53_v8 = vld [vmem:[%s1229_s1 + $0x70] sm:$0xff]  ;;  %v40_v16 = vld [vmem:[%s1229_s1 + $0x8] sm:$0xff] }
  0x1c   :  { %170 = vadd.xlane.f32.xlu1 %v169_v26  ;;  %167 = vadd.xlane.f32.xlu0 %v166_v28  ;;  %v94_v3 = vmul.f32 %v71_v63, %v48_v62  ;;  %v93_v5 = vmul.f32 %v70_v1, %v47_v0  ;;  %v62_v7 = vld [vmem:[%s1230_s2] sm:$0xff]  ;;  %v76_v9 = vld [vmem:[%s1230_s2 + $0x70] sm:$0xff]  ;;  %v63_v17 = vld [vmem:[%s1230_s2 + $0x8] sm:$0xff] }
  0x1d   :  { %v127_v4 = vsel %vm108_vm0, %v91_v61, 0.0  ;;  %v85_v11 = vmul.f32 %v62_v7, %v39_v6  ;;  %v99_v13 = vmul.f32 %v76_v9, %v53_v8  ;;  %v49_v14 = vld [vmem:[%s1229_s1 + $0x50] sm:$0xff]  ;;  %v86_v21 = vmul.f32 %v63_v17, %v40_v16 }
  0x1e   :  { %v136_v10 = vsel %vm108_vm0, %v94_v3, 0.0  ;;  %v133_v12 = vsel %vm108_vm0, %v93_v5, 0.0  ;;  %v72_v15 = vld [vmem:[%s1230_s2 + $0x50] sm:$0xff] }
  0x1f   :  { %v109_v18 = vsel %vm108_vm0, %v85_v11, 0.0  ;;  %v95_v19 = vmul.f32 %v72_v15, %v49_v14  ;;  %v151_v20 = vsel %vm108_vm0, %v99_v13, 0.0  ;;  %v41_v22 = vld [vmem:[%s1229_s1 + $0x10] sm:$0xff]  ;;  %v112_v25 = vsel %vm108_vm0, %v86_v21, 0.0 }
  0x20   :  { %119 = vadd.xlane.f32.xlu1 %v118_v34  ;;  %173 = vadd.xlane.f32.xlu0 %v172_v36  ;;  %v64_v23 = vld [vmem:[%s1230_s2 + $0x10] sm:$0xff] }
  0x21   :  { %v139_v24 = vsel %vm108_vm0, %v95_v19, 0.0  ;;  %v87_v26 = vmul.f32 %v64_v23, %v41_v22 }
  0x23   :  { %v115_v27 = vsel %vm108_vm0, %v87_v26, 0.0 }
  0x24   :  { %125 = vadd.xlane.f32.xlu1 %v124_v42  ;;  %122 = vadd.xlane.f32.xlu0 %v121_v44 }
  0x28   :  { %146 = vadd.xlane.f32.xlu1 %v145_v50  ;;  %143 = vadd.xlane.f32.xlu0 %v142_v52 }
  0x2c   :  { %177 = vadd.xlane.f32.xlu1 %v176_v58  ;;  %149 = vadd.xlane.f32.xlu0 %v148_v60 }
  0x30   :  { %131 = vadd.xlane.f32.xlu1 %v130_v2  ;;  %128 = vadd.xlane.f32.xlu0 %v127_v4 }
  0x34   :  { %137 = vadd.xlane.f32.xlu1 %v136_v10  ;;  %134 = vadd.xlane.f32.xlu0 %v133_v12 }
  0x38   :  { %110 = vadd.xlane.f32.xlu1 %v109_v18  ;;  %152 = vadd.xlane.f32.xlu0 %v151_v20 }
  0x3c   :  { %140 = vadd.xlane.f32.xlu1 %v139_v24  ;;  %113 = vadd.xlane.f32.xlu0 %v112_v25 }
  0x40   :  { %116 = vadd.xlane.f32.xlu0 %v115_v27 }
  0x9d   :  { %v162_v28 = vpop.xlane.xlu1 %161  ;;  %v156_v29 = vpop.xlane.xlu0 %155 }
  0x9e   :  { %v231_v39 = vrot.slane %v162_v28, 6  ;;  %v228_v43 = vrot.slane %v156_v29, 6 }
  0xa1   :  { %v165_v30 = vpop.xlane.xlu1 %164  ;;  %v159_v31 = vpop.xlane.xlu0 %158 }
  0xa2   :  { %v229_v40 = vrot.slane %v159_v31, 6  ;;  %v247_v48 = vrot.slane %v165_v30, 4  ;;  %v233_v63 = vrot.slane %v165_v30, 6 }
  0xa4   :  { %v232_v45 = vsel %vm184_vm2, %v229_v40, %v231_v39  ;;  %v230_v51 = vsel %vm184_vm2, %v228_v43, %v229_v40  ;;  %v234_v9 = vsel %vm184_vm2, %v231_v39, %v233_v63 }
  0xa5   :  { %v171_v32 = vpop.xlane.xlu1 %170  ;;  %v168_v33 = vpop.xlane.xlu0 %167 }
  0xa6   :  { %v250_v49 = vrot.slane %v171_v32, 4  ;;  %v248_v50 = vrot.slane %v168_v33, 4 }
  0xa8   :  { %v249_v58 = vsel %vm206_vm3, %v247_v48, %v248_v50  ;;  %v251_v59 = vsel %vm206_vm3, %v248_v50, %v250_v49 }
  0xa9   :  { %v980_v34 = vpop.xlane.xlu1 %119  ;;  %v174_v35 = vpop.xlane.xlu0 %173 }
  0xaa   :  { %v252_v44 = vrot.slane %v174_v35, 4  ;;  %v185_v0 = vrot.slane %v980_v34, 6 }
  0xac   :  { %v253_v55 = vsel %vm206_vm3, %v250_v49, %v252_v44 }
  0xad   :  { %v982_v36 = vpop.xlane.xlu1 %125  ;;  %v123_v37 = vpop.xlane.xlu0 %122 }
  0xae   :  { %v186_v1 = vrot.slane %v123_v37, 6  ;;  %v188_v8 = vrot.slane %v982_v36, 6 }
  0xb0   :  { %v187_v11 = vsel %vm184_vm2, %v185_v0, %v186_v1  ;;  %v189_v24 = vsel %vm184_vm2, %v186_v1, %v188_v8 }
  0xb1   :  { %v147_v38 = vpop.xlane.xlu1 %146  ;;  %v984_v41 = vpop.xlane.xlu0 %143 }
  0xb2   :  { %v239_v52 = vadd.f32 %v228_v43, %v984_v41  ;;  %v240_v53 = vadd.f32 %v230_v51, %v147_v38  ;;  %v214_v28 = vrot.slane %v984_v41, 4 }
  0xb4   :  { %v994_v60 = vadd.f32 %v249_v58, %v239_v52  ;;  %v996_v61 = vadd.f32 %v251_v59, %v240_v53 }
  0xb5   :  { %v178_v42 = vpop.xlane.xlu1 %177  ;;  %v150_v46 = vpop.xlane.xlu0 %149 }
  0xb6   :  { %v241_v47 = vadd.f32 %v232_v45, %v150_v46  ;;  %v254_v4 = vrot.slane %v178_v42, 4  ;;  %v287_v5 = vrot.slane %v994_v60, 2  ;;  %v288_v6 = vrot.slane %v996_v61, 2 }
  0xb8   :  { %v990_v57 = vadd.f32 %v253_v55, %v241_v47  ;;  %v255_v14 = vsel %vm206_vm3, %v252_v44, %v254_v4  ;;  %v289_v23 = vsel %vm286_vm4, %v287_v5, %v288_v6 }
  0xb9   :  { %v132_v54 = vpop.xlane.xlu1 %131  ;;  %v129_v56 = vpop.xlane.xlu0 %128  ;;  %v298_v35 = vsel %vm264_vm5, %v289_v23, 0.0 }
  0xba   :  { %v290_v3 = vrot.slane %v990_v57, 2  ;;  %v192_v12 = vrot.slane %v132_v54, 6  ;;  %v190_v16 = vrot.slane %v129_v56, 6  ;;  %v207_v17 = vrot.slane %v132_v54, 4 }
  0xbc   :  { %v291_v15 = vsel %vm286_vm4, %v288_v6, %v290_v3  ;;  %v193_v31 = vsel %vm184_vm2, %v190_v16, %v192_v12  ;;  %v191_v41 = vsel %vm184_vm2, %v188_v8, %v190_v16 }
  0xbd   :  { %v138_v62 = vpop.xlane.xlu1 %137  ;;  %v135_v2 = vpop.xlane.xlu0 %134  ;;  %v299_v27 = vsel %vm264_vm5, %v291_v15, 0.0  ;;  %v201_v47 = vadd.f32 %v193_v31, %v980_v34 }
  0xbe   :  { %v208_v18 = vrot.slane %v135_v2, 4  ;;  %v210_v19 = vrot.slane %v138_v62, 4  ;;  %v300_v39 = vadd.f32 %v299_v27, %v298_v35 }
  0xc0   :  { %v209_v32 = vsel %vm206_vm3, %v207_v17, %v208_v18  ;;  %v211_v33 = vsel %vm206_vm3, %v208_v18, %v210_v19 }
  0xc1   :  { %v111_v7 = vpop.xlane.xlu1 %110  ;;  %v153_v10 = vpop.xlane.xlu0 %152 }
  0xc2   :  { %v242_v13 = vadd.f32 %v234_v9, %v153_v10  ;;  %v198_v21 = vadd.f32 %v187_v11, %v111_v7 }
  0xc4   :  { %v1007_v20 = vadd.f32 %v255_v14, %v242_v13  ;;  %v220_v36 = vadd.f32 %v209_v32, %v198_v21 }
  0xc5   :  { %v141_v22 = vpop.xlane.xlu1 %140  ;;  %v114_v25 = vpop.xlane.xlu0 %113 }
  0xc6   :  { %v212_v26 = vrot.slane %v141_v22, 4  ;;  %v199_v29 = vadd.f32 %v189_v24, %v114_v25  ;;  %v292_v30 = vrot.slane %v1007_v20, 2  ;;  %v265_v50 = vsel %vm264_vm5, %v220_v36, 0.0 }
  0xc8   :  { %v221_v37 = vadd.f32 %v211_v33, %v199_v29  ;;  %v293_v38 = vsel %vm286_vm4, %v290_v3, %v292_v30  ;;  %v215_v40 = vsel %vm206_vm3, %v212_v26, %v214_v28  ;;  %v213_v48 = vsel %vm206_vm3, %v210_v19, %v212_v26 }
  0xc9   :  { %v117_v42 = vpop.xlane.xlu0 %116  ;;  %v301_v43 = vsel %vm264_vm5, %v293_v38, 0.0  ;;  %v303_v49 = vsel %vm270_vm6, %v292_v30, 0.0  ;;  %v223_v53 = vadd.f32 %v215_v40, %v201_v47  ;;  %v397_v47 = vld [vmem:[%s1231_s3] sm:$0x1] }
  0xca   :  { %v266_v44 = vsel %vm264_vm5, %v221_v37, 0.0  ;;  %v200_v45 = vadd.f32 %v191_v41, %v117_v42  ;;  %v302_v46 = vadd.f32 %v301_v43, %v300_v39 }
  0xcb   :  { %v267_v54 = vadd.f32 %v266_v44, %v265_v50  ;;  %v271_v58 = vsel %vm270_vm6, %v223_v53, 0.0 }
  0xcc   :  { %v222_v51 = vadd.f32 %v213_v48, %v200_v45  ;;  %v304_v52 = vadd.f32 %v303_v49, %v302_v46  ;;  %v398_v48 = vld [vmem:[%s1232_s4] sm:$0x1] }
  0xcd   :  { %v399_v49 = vmul.f32 %v398_v48, %v397_v47  ;;  %v551_v47 = vld [vmem:[%s1233_s5 + $0xd0] sm:$0xff]  ;;  %v550_v48 = vld [vmem:[%s1233_s5 + $0xc8] sm:$0xff] }
  0xce   :  { %305 = vadd.xlane.f32.xlu0 %v304_v52  ;;  %v268_v55 = vsel %vm264_vm5, %v222_v51, 0.0 }
  0xcf   :  { %v269_v56 = vadd.f32 %v268_v55, %v267_v54  ;;  %v401_v50 = vsel %vm400_vm7, %v399_v49, 0.0  ;;  %v549_v49 = vld [vmem:[%s1233_s5 + $0xc0] sm:$0xff] }
  0xd1   :  { %v272_v59 = vadd.f32 %v271_v58, %v269_v56 }
  0xd3   :  { %273 = vadd.xlane.f32.xlu1 %v272_v59 }
 0x157   :  { %v306_v62 = vpop.xlane.xlu0 %305 }
 0x158   :  { %v307_v34 = vrot.slane %v306_v62, 4 }
 0x15a   :  { %v308_v63 = vadd.f32 %v307_v34, %v306_v62 }
 0x15c   :  { %v309_v0 = vrot.slane %v308_v63, 2  ;;  %v274_v1 = vpop.xlane.xlu1 %273 }
 0x15d   :  { %v275_v2 = vrot.slane %v274_v1, 4 }
 0x15e   :  { %v310_v4 = vadd.f32 %v309_v0, %v308_v63 }
 0x15f   :  { %v276_v3 = vadd.f32 %v275_v2, %v274_v1  ;;  %v779_v2 = vmov 0  }
 0x160   :  { %v311_v7 = vrot.slane %v310_v4, 1  ;;  %761 = vset.pattern.permute.xlu1 %v779_v2  ;;  %760 = vset.pattern.permute.xlu0 %v779_v2 }
 0x161   :  { %v277_v5 = vrot.slane %v276_v3, 2 }
 0x162   :  { %v312_v10 = vadd.f32 %v311_v7, %v310_v4  ;;  %v780_v4 = vmov 0.0  }
 0x163   :  { %v278_v6 = vadd.f32 %v277_v5, %v276_v3  ;;  %674 = vmatprep.subr.mxu0 %v780_v4  ;;  %709 = vmatprep.subr.mxu1 %v780_v4 }
 0x164   :  { %706 = vmatprep.mubr.msk.f32.mxu0 %vm781_vm8, %v780_v4  ;;  %741 = vmatprep.mubr.msk.f32.mxu1 %vm781_vm8, %v780_v4 }
 0x165   :  { %v279_v8 = vrot.slane %v278_v6, 1 }
 0x167   :  { %v280_v9 = vadd.f32 %v279_v8, %v278_v6 }
 0x169   :  { %744 = vpush %v280_v9 }
 0x16a   :  { %746 = vpush %v312_v10 }
 0x19a   :  { %s745_s1 = spop %744 }
 0x19b   :  { %s747_s2 = spop %746 }
 0x19c   :  { %s314_s18 = sadd.f32 %s747_s2, %s745_s1 }
 0x19e   :  { %s315_s19 = smul.f32 0.016666668, %s314_s18 }
 0x1a0   :  { %v316_v11 = vstv %s315_s19 }
 0x1a1   :  { %v1029_v12 = vsub.f32 %v220_v36, %v316_v11  ;;  %v1031_v13 = vsub.f32 %v221_v37, %v316_v11  ;;  %v1033_v14 = vsub.f32 %v222_v51, %v316_v11  ;;  %v1035_v15 = vsub.f32 %v223_v53, %v316_v11 }
 0x1a2   :  { %v341_v16 = vsub.f32 %v994_v60, %v316_v11  ;;  %v342_v17 = vsub.f32 %v996_v61, %v316_v11  ;;  %v343_v18 = vsub.f32 %v990_v57, %v316_v11  ;;  %v344_v19 = vsub.f32 %v1007_v20, %v316_v11 }
 0x1a3   :  { %v321_v21 = vmul.f32 %v1029_v12, %v1029_v12  ;;  %v322_v22 = vmul.f32 %v1031_v13, %v1031_v13  ;;  %v323_v23 = vmul.f32 %v1033_v14, %v1033_v14  ;;  %v324_v60 = vmul.f32 %v1035_v15, %v1035_v15 }
 0x1a4   :  { %v345_v24 = vmul.f32 %v341_v16, %v341_v16  ;;  %v346_v25 = vmul.f32 %v342_v17, %v342_v17  ;;  %v347_v26 = vmul.f32 %v343_v18, %v343_v18  ;;  %v348_v27 = vmul.f32 %v344_v19, %v344_v19 }
 0x1a5   :  { %v325_v57 = vsel %vm264_vm5, %v321_v21, 0.0  ;;  %v326_v61 = vsel %vm264_vm5, %v322_v22, 0.0  ;;  %v328_v31 = vsel %vm264_vm5, %v323_v23, 0.0  ;;  %v330_v37 = vsel %vm270_vm6, %v324_v60, 0.0  ;;  %v472_v23 = vld [vmem:[%s1233_s5 + $0x98] sm:$0xff]  ;;  %v469_v60 = vld [vmem:[%s1233_s5 + $0x80] sm:$0xff] }
 0x1a6   :  { %v327_v20 = vadd.f32 %v326_v61, %v325_v57  ;;  %v353_v28 = vrot.slane %v345_v24, 2  ;;  %v354_v29 = vrot.slane %v346_v25, 2  ;;  %v356_v30 = vrot.slane %v347_v26, 2  ;;  %675 = vmatpush3.msra.mxu0 %v472_v23  ;;  %v468_v57 = vld [vmem:[%s1233_s5 + $0x78] sm:$0xff] }
 0x1a7   :  { %v358_v32 = vrot.slane %v348_v27, 2  ;;  %v392_v19 = vstv %s638_s28  ;;  %676 = vmatprep.subr.mxu0 %v780_v4  ;;  %v471_v27 = vld [vmem:[%s1233_s5 + $0x90] sm:$0xff] }
 0x1a8   :  { %v329_v33 = vadd.f32 %v328_v31, %v327_v20  ;;  %v355_v35 = vsel %vm286_vm4, %v353_v28, %v354_v29  ;;  %v357_v36 = vsel %vm286_vm4, %v354_v29, %v356_v30  ;;  %677 = vmatpush3.msra.mxu0 %v471_v27  ;;  %v466_v20 = vld [vmem:[%s1233_s5 + $0x68] sm:$0xff]  ;;  %v465_v28 = vld [vmem:[%s1233_s5 + $0x60] sm:$0xff]  ;;  %v464_v29 = vld [vmem:[%s1233_s5 + $0x58] sm:$0xff] }
 0x1a9   :  { %v359_v38 = vsel %vm286_vm4, %v356_v30, %v358_v32  ;;  %v364_v39 = vsel %vm264_vm5, %v355_v35, 0.0  ;;  %v365_v40 = vsel %vm264_vm5, %v357_v36, 0.0  ;;  %v369_v45 = vsel %vm270_vm6, %v358_v32, 0.0  ;;  %678 = vmatprep.subr.mxu0 %v780_v4  ;;  %v463_v30 = vld [vmem:[%s1233_s5 + $0x50] sm:$0xff]  ;;  %v462_v31 = vld [vmem:[%s1233_s5 + $0x48] sm:$0xff]  ;;  %v461_v32 = vld [vmem:[%s1233_s5 + $0x40] sm:$0xff] }
 0x1aa   :  { %v331_v41 = vadd.f32 %v330_v37, %v329_v33  ;;  %v366_v42 = vadd.f32 %v365_v40, %v364_v39  ;;  %v367_v43 = vsel %vm264_vm5, %v359_v38, 0.0  ;;  %v460_v33 = vld [vmem:[%s1233_s5 + $0x38] sm:$0xff]  ;;  %v459_v35 = vld [vmem:[%s1233_s5 + $0x30] sm:$0xff]  ;;  %v458_v36 = vld [vmem:[%s1233_s5 + $0x28] sm:$0xff] }
 0x1ab   :  { %v457_v37 = vld [vmem:[%s1233_s5 + $0x20] sm:$0xff]  ;;  %v560_v38 = vld [vmem:[%s1233_s5 + $0x118] sm:$0xff]  ;;  %v559_v39 = vld [vmem:[%s1233_s5 + $0x110] sm:$0xff] }
 0x1ac   :  { %332 = vadd.xlane.f32.xlu1 %v331_v41  ;;  %v368_v44 = vadd.f32 %v367_v43, %v366_v42  ;;  %710 = vmatpush3.msra.mxu1 %v560_v38  ;;  %v558_v40 = vld [vmem:[%s1233_s5 + $0x108] sm:$0xff]  ;;  %v557_v41 = vld [vmem:[%s1233_s5 + $0x100] sm:$0xff]  ;;  %v556_v42 = vld [vmem:[%s1233_s5 + $0xf8] sm:$0xff] }
 0x1ad   :  { %711 = vmatprep.subr.mxu1 %v780_v4  ;;  %v555_v43 = vld [vmem:[%s1233_s5 + $0xf0] sm:$0xff]  ;;  %v473_v27 = vld [vmem:[%s1233_s5 + $0x120] sm:$0x1] }
 0x1ae   :  { %v370_v46 = vadd.f32 %v369_v45, %v368_v44  ;;  %712 = vmatpush3.msra.mxu1 %v559_v39  ;;  %v554_v44 = vld [vmem:[%s1233_s5 + $0xe8] sm:$0xff]  ;;  %v553_v45 = vld [vmem:[%s1233_s5 + $0xe0] sm:$0xff] }
 0x1af   :  { %713 = vmatprep.subr.mxu1 %v780_v4 }
 0x1b0   :  { %371 = vadd.xlane.f32.xlu0 %v370_v46  ;;  %402 = vadd.xlane.f32.xlu1 %v401_v50  ;;  %v552_v46 = vld [vmem:[%s1233_s5 + $0xd8] sm:$0xff] }
 0x1b1   :  { %714 = vmatpush3.msra.mxu1 %v558_v40  ;;  %v548_v50 = vld [vmem:[%s1233_s5 + $0xb8] sm:$0xff] }
 0x1b2   :  { %715 = vmatprep.subr.mxu1 %v780_v4 }
 0x1b3   :  { %716 = vmatpush3.msra.mxu1 %v557_v41 }
 0x1b4   :  { %717 = vmatprep.subr.mxu1 %v780_v4 }
 0x1b5   :  { %718 = vmatpush3.msra.mxu1 %v556_v42 }
 0x1b6   :  { %719 = vmatprep.subr.mxu1 %v780_v4 }
 0x1b7   :  { %720 = vmatpush3.msra.mxu1 %v555_v43 }
 0x1b8   :  { %721 = vmatprep.subr.mxu1 %v780_v4 }
 0x1b9   :  { %722 = vmatpush3.msra.mxu1 %v554_v44 }
 0x1ba   :  { %723 = vmatprep.subr.mxu1 %v780_v4 }
 0x1bb   :  { %724 = vmatpush3.msra.mxu1 %v553_v45 }
 0x1bc   :  { %725 = vmatprep.subr.mxu1 %v780_v4 }
 0x1bd   :  { %726 = vmatpush3.msra.mxu1 %v552_v46 }
 0x1be   :  { %727 = vmatprep.subr.mxu1 %v780_v4 }
 0x1bf   :  { %728 = vmatpush3.msra.mxu1 %v551_v47 }
 0x1c0   :  { %729 = vmatprep.subr.mxu1 %v780_v4 }
 0x1c1   :  { %730 = vmatpush3.msra.mxu1 %v550_v48 }
 0x1c2   :  { %731 = vmatprep.subr.mxu1 %v780_v4 }
 0x1c3   :  { %732 = vmatpush3.msra.mxu1 %v549_v49 }
 0x1c4   :  { %733 = vmatprep.subr.mxu1 %v780_v4 }
 0x1c5   :  { %734 = vmatpush3.msra.mxu1 %v548_v50 }
 0x1c6   :  { %735 = vmatprep.subr.mxu1 %v780_v4 }
 0x235   :  { %v333_v51 = vpop.xlane.xlu1 %332 }
 0x236   :  { %v334_v52 = vrot.slane %v333_v51, 4 }
 0x238   :  { %v335_v53 = vadd.f32 %v334_v52, %v333_v51  ;;  %v413_v52 = vld [vmem:[%s1233_s5 + $0x8] sm:$0xff] }
 0x239   :  { %v372_v54 = vpop.xlane.xlu0 %371  ;;  %v403_v7 = vpop.xlane.xlu1 %402 }
 0x23a   :  { %v336_v55 = vrot.slane %v335_v53, 2  ;;  %v373_v56 = vrot.slane %v372_v54, 4  ;;  %v404_v8 = vrot.slane %v403_v7, 4 }
 0x23c   :  { %v374_v58 = vadd.f32 %v373_v56, %v372_v54  ;;  %v337_v59 = vadd.f32 %v336_v55, %v335_v53  ;;  %v405_v9 = vadd.f32 %v404_v8, %v403_v7  ;;  %v412_v53 = vld [vmem:[%s1233_s5] sm:$0xff]  ;;  %v414_v55 = vld [vmem:[%s1233_s5 + $0x10] sm:$0xff] }
 0x23e   :  { %v375_v62 = vrot.slane %v374_v58, 2  ;;  %v338_v34 = vrot.slane %v337_v59, 1  ;;  %v406_v10 = vrot.slane %v405_v9, 2 }
 0x240   :  { %v339_v63 = vadd.f32 %v338_v34, %v337_v59  ;;  %v376_v0 = vadd.f32 %v375_v62, %v374_v58  ;;  %v407_v11 = vadd.f32 %v406_v10, %v405_v9  ;;  %v415_v34 = vld [vmem:[%s1233_s5 + $0x18] sm:$0x3f]  ;;  %v450_v10 = vld [vmem:[%s1233_s5 + $0x1e] sm:$0x1] }
 0x242   :  { %748 = vpush %v339_v63  ;;  %v377_v1 = vrot.slane %v376_v0, 1  ;;  %v408_v16 = vrot.slane %v407_v11, 1 }
 0x244   :  { %v378_v3 = vadd.f32 %v377_v1, %v376_v0  ;;  %v409_v17 = vadd.f32 %v408_v16, %v407_v11 }
 0x246   :  { %750 = vpush %v378_v3 }
 0x273   :  { %s749_s3 = spop %748 }
 0x277   :  { %s751_s4 = spop %750 }
 0x278   :  { %s380_s24 = sadd.f32 %s751_s4, %s749_s3 }
 0x27a   :  { %s381_s25 = smul.f32 0.016666668, %s380_s24 }
 0x27c   :  { %s382_s26 = sadd.f32 1e-05, %s381_s25 }
 0x27e   :  { %v383_v5 = vstv %s382_s26 }
 0x27f   :  { %762 = vrsqrt.f32 %v383_v5 }
 0x28c   :  { %v763_v6 = vpop.eup %762 }
 0x28d   :  { %752 = vpush %v763_v6 }
 0x28e   :  { %754 = vpush %v409_v17 }
 0x2be   :  { %s753_s29 = spop %752 }
 0x2bf   :  { %s386_s0 = smul.f32 %s753_s29, %s36_s27  ;;  %s755_s15 = spop %754 }
 0x2c0   :  { %s411_s16 = sadd.f32 %s755_s15, %s639_s14 }
 0x2c1   :  { %v387_v18 = vstv %s386_s0 }
 0x2c2   :  { %v388_v21 = vmul.f32 %v387_v18, %v1029_v12  ;;  %v389_v22 = vmul.f32 %v387_v18, %v1031_v13  ;;  %v390_v24 = vmul.f32 %v387_v18, %v1033_v14  ;;  %v470_v12 = vld [vmem:[%s1233_s5 + $0x88] sm:$0xff]  ;;  %v391_v13 = vmul.f32 %v387_v18, %v1035_v15  ;;  %v467_v15 = vld [vmem:[%s1233_s5 + $0x70] sm:$0xff] }
 0x2c3   :  { %679 = vmatpush3.msra.mxu0 %v470_v12  ;;  %v451_v11 = vstv %s411_s16 }
 0x2c4   :  { %v394_v25 = vadd.f32 %v392_v19, %v389_v22  ;;  %v393_v26 = vadd.f32 %v392_v19, %v388_v21  ;;  %v395_v14 = vadd.f32 %v392_v19, %v390_v24  ;;  %680 = vmatprep.subr.mxu0 %v780_v4  ;;  %v396_v61 = vadd.f32 %v392_v19, %v391_v13  ;;  %v454_v19 = vld [vmem:[%s1233_s5 + $0x1f] sm:$0x1]  ;;  %v547_v24 = vld [vmem:[%s1233_s5 + $0xb0] sm:$0xff] }
 0x2c5   :  { %681 = vmatpush3.msra.mxu0 %v469_v60  ;;  %v452_v18 = vmul.f32 %v451_v11, %v450_v10  ;;  %736 = vmatpush3.msra.mxu1 %v547_v24 }
 0x2c6   :  { %423 = vperm.xlu1 %761, %v394_v25   ;;  %418 = vperm.xlu0 %760, %v393_v26   ;;  %v546_v25 = vld [vmem:[%s1233_s5 + $0xa8] sm:$0xff]  ;;  %v545_v26 = vld [vmem:[%s1233_s5 + $0xa0] sm:$0xff] }
 0x2c7   :  { %682 = vmatprep.subr.mxu0 %v780_v4  ;;  %737 = vmatprep.subr.mxu1 %v780_v4 }
 0x2c8   :  { %683 = vmatpush3.msra.mxu0 %v468_v57  ;;  %738 = vmatpush3.msra.mxu1 %v546_v25  ;;  %v561_v57 = vld [vmem:[%s1233_s5 + $0x121] sm:$0x1] }
 0x2c9   :  { %684 = vmatprep.subr.mxu0 %v780_v4  ;;  %739 = vmatprep.subr.mxu1 %v780_v4 }
 0x2ca   :  { %428 = vperm.xlu1 %761, %v395_v14   ;;  %685 = vmatpush3.msra.mxu0 %v467_v15 }
 0x2cb   :  { %686 = vmatprep.subr.mxu0 %v780_v4  ;;  %740 = vmatpush3.msra.mxu1 %v545_v26 }
 0x2cc   :  { %687 = vmatpush3.msra.mxu0 %v466_v20 }
 0x2cd   :  { %688 = vmatprep.subr.mxu0 %v780_v4 }
 0x2ce   :  { %433 = vperm.xlu1 %761, %v396_v61   ;;  %689 = vmatpush3.msra.mxu0 %v465_v28 }
 0x2cf   :  { %690 = vmatprep.subr.mxu0 %v780_v4 }
 0x2d0   :  { %691 = vmatpush3.msra.mxu0 %v464_v29 }
 0x2d1   :  { %692 = vmatprep.subr.mxu0 %v780_v4 }
 0x2d2   :  { %693 = vmatpush3.msra.mxu0 %v463_v30 }
 0x2d3   :  { %694 = vmatprep.subr.mxu0 %v780_v4 }
 0x2d4   :  { %695 = vmatpush3.msra.mxu0 %v462_v31 }
 0x2d5   :  { %696 = vmatprep.subr.mxu0 %v780_v4 }
 0x2d6   :  { %697 = vmatpush3.msra.mxu0 %v461_v32 }
 0x2d7   :  { %698 = vmatprep.subr.mxu0 %v780_v4 }
 0x2d8   :  { %699 = vmatpush3.msra.mxu0 %v460_v33 }
 0x2d9   :  { %700 = vmatprep.subr.mxu0 %v780_v4 }
 0x2da   :  { %701 = vmatpush3.msra.mxu0 %v459_v35 }
 0x2db   :  { %702 = vmatprep.subr.mxu0 %v780_v4 }
 0x2dc   :  { %703 = vmatpush3.msra.mxu0 %v458_v36 }
 0x2dd   :  { %704 = vmatprep.subr.mxu0 %v780_v4 }
 0x2de   :  { %705 = vmatpush3.msra.mxu0 %v457_v37 }
 0x341   :  { %v424_v51 = vpop.permute.xlu1 %423  ;;  %v419_v54 = vpop.permute.xlu0 %418 }
 0x342   :  { %v437_v56 = vmul.f32 %v424_v51, %v413_v52  ;;  %v436_v58 = vmul.f32 %v419_v54, %v412_v53 }
 0x344   :  { %v440_v63 = vadd.f32 %v437_v56, %v436_v58 }
 0x345   :  { %v429_v59 = vpop.permute.xlu1 %428 }
 0x346   :  { %v438_v62 = vmul.f32 %v429_v59, %v414_v55 }
 0x348   :  { %v441_v2 = vadd.f32 %v440_v63, %v438_v62 }
 0x349   :  { %v434_v0 = vpop.permute.xlu1 %433 }
 0x34a   :  { %v439_v1 = vmul.f32 %v434_v0, %v415_v34 }
 0x34c   :  { %v442_v3 = vsel %vm286_vm4, %v439_v1, 0.0 }
 0x34d   :  { %v443_v5 = vadd.f32 %v442_v3, %v441_v2 }
 0x34f   :  { %v444_v6 = vrot.slane %v443_v5, 4 }
 0x351   :  { %v445_v7 = vadd.f32 %v444_v6, %v443_v5 }
 0x353   :  { %v446_v8 = vrot.slane %v445_v7, 2 }
 0x355   :  { %v447_v9 = vadd.f32 %v446_v8, %v445_v7 }
 0x357   :  { %v448_v16 = vrot.slane %v447_v9, 1 }
 0x359   :  { %v449_v17 = vadd.f32 %v448_v16, %v447_v9 }
 0x35b   :  { %v453_v21 = vadd.f32 %v452_v18, %v449_v17 }
 0x35d   :  { %v455_v22 = vadd.f32 %v454_v19, %v453_v21 }
 0x35f   :  { %v456_v23 = vmax.f32 %v455_v22, 0.0 }
 0x361   :  { %707 = vmatmul.mubr.f32.vlgmr.msra.gmra.mxu0 %v456_v23 }
 0x421   :  { %v540_v12 = vpop.f32.mrf.mxu0 }
 0x422   :  { %v541_v13 = vadd.f32 %v540_v12, %v473_v27 }
 0x423   :  { %v708_v14 = vpop.f32.mrf.mxu0 }
 0x424   :  { %v544_v60 = vmax.f32 %v541_v13, 0.0 }
 0x426   :  { %742 = vmatmul.mubr.f32.vlgmr.msra.gmra.mxu1 %v544_v60 }
 0x4e6   :  { %v628_v61 = vpop.f32.mrf.mxu1 }
 0x4e7   :  { %v629_v15 = vadd.f32 %v628_v61, %v561_v57 }
 0x4e8   :  { %v743_v20 = vpop.f32.mrf.mxu1 }
 0x4e9   :  { %632 = vst [vmem:[%s1234_s6] sm:$0x1] %v629_v15 }
 0x4ea   :  { %637 = vsyncpa [#allocation3], 1 }

</bundles_post_ra>
